<compile_context>
chip_gen: v6e
topology: v6e:2x2x1
jax: 0.10.0
libtpu: 0.0.40
codegen_flags: <defaults>
</compile_context>

<pallas_src>
import functools
import math

import jax
import jax.numpy as jnp
from jax.experimental import pallas as pl
from jax.experimental.pallas import tpu as pltpu

_EPS = 1e-5
_NEG_SLOPE = 0.01


def _round_up(x: int, m: int) -> int:
    return ((x + m - 1) // m) * m


def _vmem_budget_bytes() -> int:
    cap = 64 * 1024 * 1024                      # conservative default (v7x per-TC)
    try:
        info = pltpu.get_tpu_info()
        cap = int(getattr(info, "vmem_capacity_bytes", cap))
    except Exception:
        pass
    return (cap // 4) * 3                       # leave headroom for the compiler


def _pick_tile_n(requested: int, n: int, e_p: int, f_in_full: int, f_out_p: int,
                 h_bytes: int, budget: int) -> int:
    """Largest 128-multiple node tile whose working set fits the VMEM budget."""
    n_cap = _round_up(n, 128)
    tn = max(128, min(_round_up(max(requested, 128), 128), n_cap))

    def fits(t):
        # K1: resident H^T X accumulator (x2) + double-buffered X / H tiles.
        k1 = 2 * e_p * f_in_full * 4 + 2 * t * (f_in_full * 4 + e_p * h_bytes)
        # K3: resident Y@theta + double-buffered H-in / out tiles.
        k3 = 2 * e_p * f_out_p * h_bytes + 2 * t * (e_p * h_bytes + f_out_p * 4)
        return max(k1, k3) + (2 << 20) <= budget

    while tn > 128 and not fits(tn):
        tn -= 128
    return tn


# ---------------------------------------------------------------------------
# K1: accumulate BN sums and H^T @ [X | 1] over node tiles (reduction axis).
# ---------------------------------------------------------------------------
def _accum_kernel(x_ref, h_ref, htx_ref, xsum_ref, xsq_ref, *, mxu_dtype):
    i = pl.program_id(0)
    x = x_ref[...]                                   # f32 [tn, Fi] (padded rows 0)
    h = h_ref[...]                                   # mxu [tn, E]
    dims = (((0,), (0,)), ((), ()))                  # contract node axes: H^T @ X
    htx = jax.lax.dot_general(h, x.astype(mxu_dtype), dims,
                              preferred_element_type=jnp.float32)
    xs = jnp.sum(x, axis=0, keepdims=True)           # BN batch sums in f32
    xq = jnp.sum(x * x, axis=0, keepdims=True)

    @pl.when(i == 0)
    def _():                                          # first tile: write directly
        htx_ref[...] = htx
        xsum_ref[...] = xs
        xsq_ref[...] = xq

    @pl.when(i != 0)
    def _():
        htx_ref[...] += htx
        xsum_ref[...] += xs
        xsq_ref[...] += xq


# ---------------------------------------------------------------------------
# K2: per hyperedge tile   Ytheta = diag(w/d_e) (H^T BN(X)) @ theta
#     H^T BN(X) = (H^T X) * a + (H^T 1) * b   with BN(X) = X*a + b.
# ---------------------------------------------------------------------------
def _edge_kernel(htx_ref, xsum_ref, xsq_ref, gamma_ref, beta_ref, w_ref,
                 de_ref, theta_ref, yt_ref, *, n_nodes: int, ones_col: int,
                 mxu_dtype):
    inv_n = 1.0 / float(n_nodes)
    mean = xsum_ref[...] * inv_n                              # [1, Fi]
    var = jnp.maximum(xsq_ref[...] * inv_n - mean * mean, 0.0)
    a = gamma_ref[...] * jax.lax.rsqrt(var + _EPS)            # [1, Fi]
    b = beta_ref[...] - mean * a                              # [1, Fi]
    htx = htx_ref[...]                                        # [te, Fi] = H^T X
    hcol = htx[:, ones_col:ones_col + 1]                      # [te, 1]  = H^T 1
    hts = htx * a + hcol * b                                  # H^T BN(X)
    de = de_ref[...]                                          # [te, 1]
    s_e = w_ref[...] * jnp.where(de != 0, 1.0 / de, de)       # diag(W_e/d_e) scale
    y = (s_e * hts).astype(mxu_dtype)
    yt_ref[...] = jnp.dot(y, theta_ref[...], preferred_element_type=jnp.float32)


# ---------------------------------------------------------------------------
# K3: per node tile   out = LeakyReLU( (1/d_v)[:,None] * (H @ Ytheta) )
# ---------------------------------------------------------------------------
def _node_kernel(h_ref, dv_ref, yt_ref, out_ref):
    dv = dv_ref[...]                                          # [tn, 1]
    dv_inv = jnp.where(dv != 0, 1.0 / dv, dv)
    hy = jnp.dot(h_ref[...], yt_ref[...], preferred_element_type=jnp.float32)
    out = dv_inv * hy
    out_ref[...] = jnp.where(out >= 0, out, _NEG_SLOPE * out)


def hgnnp_layer(X, H, w, de, dv, theta, gamma, beta, *,
                tile_n: int = 512, use_bf16_mxu: bool = True):
    """HGNN+ layer forward.

    X:[N,F_in], H:[N,E], w=diag(W_e):[E], de=diag(D_e):[E], dv=diag(D_v):[N],
    theta:[F_in,F_out], gamma/beta:[F_in]  ->  [N, F_out] (f32)
    """
    N, F_in = X.shape
    E = H.shape[1]
    F_out = theta.shape[1]
    f32 = jnp.float32
    mxu_dtype = jnp.bfloat16 if use_bf16_mxu else jnp.float32
    h_bytes = 2 if use_bf16_mxu else 4

    # ---- padded, lane-dense shapes ----------------------------------------
    f_in_p = _round_up(F_in, 128)
    # Reserve one zero-padded lane column of X for the constant 1 (gives H^T@1
    # for free from the H^T@X matmul).  If F_in already fills its 128-lane
    # blocks, add one extra block.
    f_in_full = f_in_p if f_in_p > F_in else f_in_p + 128
    ones_col = F_in
    f_out_p = _round_up(F_out, 128)
    e_p = _round_up(E, 128)

    budget = _vmem_budget_bytes()
    tn = _pick_tile_n(tile_n, N, e_p, f_in_full, f_out_p, h_bytes, budget)
    n_p = _round_up(N, tn)
    n_tiles = n_p // tn
    te = 128
    e_tiles = e_p // te

    # ---- padded operands ----------------------------------------------------
    Xp = jnp.zeros((n_p, f_in_full), f32)
    Xp = Xp.at[:N, :F_in].set(X.astype(f32))
    Xp = Xp.at[:N, ones_col].set(1.0)                          # ones column
    Hp = jnp.pad(H.astype(f32), ((0, n_p - N), (0, e_p - E))).astype(mxu_dtype)
    wp = jnp.pad(w.astype(f32), (0, e_p - E)).reshape(e_p, 1)
    dep = jnp.pad(de.astype(f32), (0, e_p - E)).reshape(e_p, 1)
    dvp = jnp.pad(dv.astype(f32), (0, n_p - N)).reshape(n_p, 1)
    thetap = jnp.pad(theta.astype(f32),
                     ((0, f_in_full - F_in), (0, f_out_p - F_out))).astype(mxu_dtype)
    gammap = jnp.pad(gamma.astype(f32).reshape(1, F_in),
                     ((0, 0), (0, f_in_full - F_in)))
    betap = jnp.pad(beta.astype(f32).reshape(1, F_in),
                    ((0, 0), (0, f_in_full - F_in)))

    def resident(shape):
        return pl.BlockSpec(shape, lambda i: (0, 0))

    def tiled(shape):
        return pl.BlockSpec(shape, lambda i: (i, 0))

    def cparams(sem):
        return pltpu.CompilerParams(dimension_semantics=sem,
                                    vmem_limit_bytes=budget)

    # ---- K1: BN sums + H^T @ [X | 1]  (reduction over node tiles) ----------
    htx, xsum, xsq = pl.pallas_call(
        functools.partial(_accum_kernel, mxu_dtype=mxu_dtype),
        out_shape=(jax.ShapeDtypeStruct((e_p, f_in_full), f32),
                   jax.ShapeDtypeStruct((1, f_in_full), f32),
                   jax.ShapeDtypeStruct((1, f_in_full), f32)),
        grid_spec=pltpu.PrefetchScalarGridSpec(
            num_scalar_prefetch=0,
            grid=(n_tiles,),
            in_specs=[tiled((tn, f_in_full)),        # X (with ones column)
                      tiled((tn, e_p))],             # H (mxu dtype)
            out_specs=(resident((e_p, f_in_full)),   # H^T [X|1]
                       resident((1, f_in_full)),     # sum(X)
                       resident((1, f_in_full)))),   # sum(X^2)
        compiler_params=cparams(("arbitrary",)),
    )(Xp, Hp)

    # ---- K2: BN affine + edge scaling + Y @ theta (parallel over E tiles) ---
    # TODO(synk): for very large F_in x F_out, K-tile theta instead of keeping
    # it fully resident in VMEM.
    ytheta = pl.pallas_call(
        functools.partial(_edge_kernel, n_nodes=N, ones_col=ones_col,
                          mxu_dtype=mxu_dtype),
        out_shape=jax.ShapeDtypeStruct((e_p, f_out_p), f32),
        grid_spec=pltpu.PrefetchScalarGridSpec(
            num_scalar_prefetch=0,
            grid=(e_tiles,),
            in_specs=[tiled((te, f_in_full)),        # H^T [X|1]
                      resident((1, f_in_full)),      # sum(X)
                      resident((1, f_in_full)),      # sum(X^2)
                      resident((1, f_in_full)),      # gamma
                      resident((1, f_in_full)),      # beta
                      tiled((te, 1)),                # diag(W_e)
                      tiled((te, 1)),                # diag(D_e)
                      resident((f_in_full, f_out_p))],  # theta (mxu dtype)
            out_specs=tiled((te, f_out_p))),
        compiler_params=cparams(("parallel",)),
    )(htx, xsum, xsq, gammap, betap, wp, dep, thetap)

    # ---- K3: node outputs (independent tiles -> megacore parallel) ----------
    ytheta_m = ytheta.astype(mxu_dtype)              # single cast in the wrapper
    out_p = pl.pallas_call(
        _node_kernel,
        out_shape=jax.ShapeDtypeStruct((n_p, f_out_p), f32),
        grid_spec=pltpu.PrefetchScalarGridSpec(
            num_scalar_prefetch=0,
            grid=(n_tiles,),
            in_specs=[tiled((tn, e_p)),              # H (mxu dtype)
                      tiled((tn, 1)),                # diag(D_v)
                      resident((e_p, f_out_p))],     # Y theta (mxu dtype)
            out_specs=tiled((tn, f_out_p))),
        compiler_params=cparams(("parallel",)),
    )(Hp, dvp, ytheta_m)

    return out_p[:N, :F_out]


def hgnnp_layer_from_dense(X, W_e, D_e, D_v, H, theta, gamma, beta, **kwargs):
    """API-compatible adapter: W_e / D_e / D_v are the diagonal matrices of the
    PyTorch module; only their diagonals participate in the HGNN+ math."""
    return hgnnp_layer(X, H, jnp.diagonal(W_e), jnp.diagonal(D_e),
                       jnp.diagonal(D_v), theta, gamma, beta, **kwargs)


def hgnnp_reference(X, H, w, de, dv, theta, gamma, beta):
    """Pure-JAX reference following the PyTorch forward literally."""
    mean = jnp.mean(X, axis=0, keepdims=True)
    var = jnp.mean((X - mean) ** 2, axis=0, keepdims=True)
    S = (X - mean) / jnp.sqrt(var + _EPS) * gamma.reshape(1, -1) + beta.reshape(1, -1)
    W_e, D_e, D_v = jnp.diag(w), jnp.diag(de), jnp.diag(dv)
    De_inv = jnp.where(D_e != 0, 1.0 / D_e, D_e)
    Dv_inv = jnp.where(D_v != 0, 1.0 / D_v, D_v)
    Y = W_e @ De_inv @ H.T @ S
    out = Dv_inv @ H @ Y @ theta
    return jnp.where(out >= 0, out, _NEG_SLOPE * out)


if __name__ == "__main__":
    # TODO(synk): BatchNorm1d running-mean/var buffer updates (training-time side
    # effects) are not modeled; forward uses batch statistics like train-mode BN.

    def run_case(key, N, E, F_in, F_out, tile_n, use_bf16_mxu, atol, rtol,
                 check_dense_api=False):
        kx, kh, kw, kt, kg, kb = jax.random.split(key, 6)
        X = jax.random.normal(kx, (N, F_in), dtype=jnp.float32)
        H = jax.random.bernoulli(kh, p=0.4, shape=(N, E)).astype(jnp.float32)
        w = jax.random.uniform(kw, (E,), minval=0.5, maxval=1.5, dtype=jnp.float32)
        de = jnp.sum(H, axis=0)          # hyperedge degrees (zeros allowed)
        dv = H @ w                       # weighted node degrees (zeros allowed)
        stdv = 1.0 / math.sqrt(F_out)
        theta = jax.random.uniform(kt, (F_in, F_out), minval=-stdv, maxval=stdv,
                                   dtype=jnp.float32)
        gamma = 1.0 + 0.1 * jax.random.normal(kg, (F_in,), dtype=jnp.float32)
        beta = 0.1 * jax.random.normal(kb, (F_in,), dtype=jnp.float32)

        out = hgnnp_layer(X, H, w, de, dv, theta, gamma, beta,
                          tile_n=tile_n, use_bf16_mxu=use_bf16_mxu)
        out = jax.block_until_ready(out)
        ref = hgnnp_reference(X, H, w, de, dv, theta, gamma, beta)
        assert out.shape == (N, F_out)
        err = float(jnp.max(jnp.abs(out - ref)))
        assert jnp.allclose(out, ref, atol=atol, rtol=rtol), (
            f"mismatch vs reference (N={N}, E={E}): max abs err {err}")

        if check_dense_api:
            out_d = hgnnp_layer_from_dense(
                X, jnp.diag(w), jnp.diag(de), jnp.diag(dv), H, theta, gamma,
                beta, tile_n=tile_n, use_bf16_mxu=use_bf16_mxu)
            out_d = jax.block_until_ready(out_d)
            assert jnp.allclose(out_d, ref, atol=atol, rtol=rtol)

    k1, k2, k3 = jax.random.split(jax.random.PRNGKey(0), 3)

    # f32 MXU path, single node tile, tight tolerance (exact-semantics check).
    run_case(k1, N=16, E=8, F_in=32, F_out=32, tile_n=512,
             use_bf16_mxu=False, atol=2e-4, rtol=2e-4, check_dense_api=True)
    # f32 path, multiple node tiles: cross-tile BN statistics + padding/slicing.
    run_case(k2, N=300, E=12, F_in=48, F_out=40, tile_n=128,
             use_bf16_mxu=False, atol=2e-4, rtol=2e-4)
    # bf16 MXU path (default), F_in a multiple of 128 (exercises the extra
    # ones-column block); looser tolerance for bf16 matmul inputs.
    run_case(k3, N=256, E=20, F_in=128, F_out=64, tile_n=128,
             use_bf16_mxu=True, atol=3e-2, rtol=3e-2)

    print("KERNEL_OK")
</pallas_src>

<mosaic_0001>
module attributes {stable_mosaic.version = 11 : i64} {
  func.func @_accum_kernel(%arg0: i32, %arg1: memref<128x128xf32, #tpu.memory_space<vmem>>, %arg2: memref<128x128xf32, #tpu.memory_space<vmem>>, %arg3: memref<128x128xf32, #tpu.memory_space<vmem>>, %arg4: memref<1x128xf32, #tpu.memory_space<vmem>>, %arg5: memref<1x128xf32, #tpu.memory_space<vmem>>) attributes {dimension_semantics = [#tpu.dimension_semantics<arbitrary>], iteration_bounds = array<i64: 1>, scalar_prefetch = 0 : i64, scratch_operands = 0 : i64, tpu.core_type = #tpu.core_type<tc>, window_params = [{transform_indices = @transform_0, window_bounds = array<i64: 128, 128>}, {transform_indices = @transform_1, window_bounds = array<i64: 128, 128>}, {pipeline_mode = #tpu.pipeline_mode<synchronous>, transform_indices = @transform_2, window_bounds = array<i64: 128, 128>}, {pipeline_mode = #tpu.pipeline_mode<synchronous>, transform_indices = @transform_3, window_bounds = array<i64: 1, 128>}, {pipeline_mode = #tpu.pipeline_mode<synchronous>, transform_indices = @transform_4, window_bounds = array<i64: 1, 128>}]} {
    %c0 = arith.constant 0 : index
    %c0_0 = arith.constant 0 : index
    %0 = vector.load %arg1[%c0, %c0_0] : memref<128x128xf32, #tpu.memory_space<vmem>>, vector<128x128xf32>
    %c0_1 = arith.constant 0 : index
    %c0_2 = arith.constant 0 : index
    %1 = vector.load %arg2[%c0_1, %c0_2] : memref<128x128xf32, #tpu.memory_space<vmem>>, vector<128x128xf32>
    %cst = arith.constant dense<0.000000e+00> : vector<128x128xf32>
    %2 = tpu.matmul %1, %0, %cst {dimension_numbers = #tpu.dot_dimension_numbers<[0], [0], [1], [1], [0, 1, 1, 1], [], []>} : vector<128x128xf32>, vector<128x128xf32>, vector<128x128xf32> -> vector<128x128xf32>
    %cst_3 = arith.constant dense<0.000000e+00> : vector<128xf32>
    %3 = vector.multi_reduction <add>, %0, %cst_3 [0] : vector<128x128xf32> to vector<128xf32>
    %4 = vector.shape_cast %3 : vector<128xf32> to vector<1x128xf32>
    %5 = arith.mulf %0, %0 : vector<128x128xf32>
    %cst_4 = arith.constant dense<0.000000e+00> : vector<128xf32>
    %6 = vector.multi_reduction <add>, %5, %cst_4 [0] : vector<128x128xf32> to vector<128xf32>
    %7 = vector.shape_cast %6 : vector<128xf32> to vector<1x128xf32>
    %c0_i32 = arith.constant 0 : i32
    %8 = arith.cmpi eq, %arg0, %c0_i32 : i32
    %9 = arith.extui %8 : i1 to i32
    %c0_i32_5 = arith.constant 0 : i32
    %10 = arith.cmpi ne, %9, %c0_i32_5 : i32
    scf.if %10 {
      %c0_8 = arith.constant 0 : index
      %c0_9 = arith.constant 0 : index
      %14 = vector.load %arg3[%c0_8, %c0_9] : memref<128x128xf32, #tpu.memory_space<vmem>>, vector<128x128xf32>
      tpu.vector_store %arg3[%c0_8, %c0_9], %2 {strides = array<i32>} : memref<128x128xf32, #tpu.memory_space<vmem>>, vector<128x128xf32>,
      %c0_10 = arith.constant 0 : index
      %c0_11 = arith.constant 0 : index
      %15 = vector.load %arg4[%c0_10, %c0_11] : memref<1x128xf32, #tpu.memory_space<vmem>>, vector<1x128xf32>
      tpu.vector_store %arg4[%c0_10, %c0_11], %4 {strides = array<i32>} : memref<1x128xf32, #tpu.memory_space<vmem>>, vector<1x128xf32>,
      %c0_12 = arith.constant 0 : index
      %c0_13 = arith.constant 0 : index
      %16 = vector.load %arg5[%c0_12, %c0_13] : memref<1x128xf32, #tpu.memory_space<vmem>>, vector<1x128xf32>
      tpu.vector_store %arg5[%c0_12, %c0_13], %7 {strides = array<i32>} : memref<1x128xf32, #tpu.memory_space<vmem>>, vector<1x128xf32>,
    } else {
    }
    %c0_i32_6 = arith.constant 0 : i32
    %11 = arith.cmpi ne, %arg0, %c0_i32_6 : i32
    %12 = arith.extui %11 : i1 to i32
    %c0_i32_7 = arith.constant 0 : i32
    %13 = arith.cmpi ne, %12, %c0_i32_7 : i32
    scf.if %13 {
      %c0_8 = arith.constant 0 : index
      %c0_9 = arith.constant 0 : index
      %14 = vector.load %arg3[%c0_8, %c0_9] : memref<128x128xf32, #tpu.memory_space<vmem>>, vector<128x128xf32>
      %15 = arith.addf %14, %2 : vector<128x128xf32>
      %c0_10 = arith.constant 0 : index
      %c0_11 = arith.constant 0 : index
      %16 = vector.load %arg3[%c0_10, %c0_11] : memref<128x128xf32, #tpu.memory_space<vmem>>, vector<128x128xf32>
      tpu.vector_store %arg3[%c0_10, %c0_11], %15 {strides = array<i32>} : memref<128x128xf32, #tpu.memory_space<vmem>>, vector<128x128xf32>,
      %c0_12 = arith.constant 0 : index
      %c0_13 = arith.constant 0 : index
      %17 = vector.load %arg4[%c0_12, %c0_13] : memref<1x128xf32, #tpu.memory_space<vmem>>, vector<1x128xf32>
      %18 = arith.addf %17, %4 : vector<1x128xf32>
      %c0_14 = arith.constant 0 : index
      %c0_15 = arith.constant 0 : index
      %19 = vector.load %arg4[%c0_14, %c0_15] : memref<1x128xf32, #tpu.memory_space<vmem>>, vector<1x128xf32>
      tpu.vector_store %arg4[%c0_14, %c0_15], %18 {strides = array<i32>} : memref<1x128xf32, #tpu.memory_space<vmem>>, vector<1x128xf32>,
      %c0_16 = arith.constant 0 : index
      %c0_17 = arith.constant 0 : index
      %20 = vector.load %arg5[%c0_16, %c0_17] : memref<1x128xf32, #tpu.memory_space<vmem>>, vector<1x128xf32>
      %21 = arith.addf %20, %7 : vector<1x128xf32>
      %c0_18 = arith.constant 0 : index
      %c0_19 = arith.constant 0 : index
      %22 = vector.load %arg5[%c0_18, %c0_19] : memref<1x128xf32, #tpu.memory_space<vmem>>, vector<1x128xf32>
      tpu.vector_store %arg5[%c0_18, %c0_19], %21 {strides = array<i32>} : memref<1x128xf32, #tpu.memory_space<vmem>>, vector<1x128xf32>,
    } else {
    }
    return
  }
  func.func @transform_0(%arg0: i32) -> (i32, i32) {
    %c0_i32 = arith.constant 0 : i32
    %c0_i32_0 = arith.constant 0 : i32
    return %arg0, %c0_i32 : i32, i32
  }
  func.func @transform_1(%arg0: i32) -> (i32, i32) {
    %c0_i32 = arith.constant 0 : i32
    %c0_i32_0 = arith.constant 0 : i32
    return %arg0, %c0_i32 : i32, i32
  }
  func.func @transform_2(%arg0: i32) -> (i32, i32) {
    %c0_i32 = arith.constant 0 : i32
    %c0_i32_0 = arith.constant 0 : i32
    %c0_i32_1 = arith.constant 0 : i32
    return %c0_i32, %c0_i32_0 : i32, i32
  }
  func.func @transform_3(%arg0: i32) -> (i32, i32) {
    %c0_i32 = arith.constant 0 : i32
    %c0_i32_0 = arith.constant 0 : i32
    %c0_i32_1 = arith.constant 0 : i32
    return %c0_i32, %c0_i32_0 : i32, i32
  }
  func.func @transform_4(%arg0: i32) -> (i32, i32) {
    %c0_i32 = arith.constant 0 : i32
    %c0_i32_0 = arith.constant 0 : i32
    %c0_i32_1 = arith.constant 0 : i32
    return %c0_i32, %c0_i32_0 : i32, i32
  }
}

</mosaic_0001>

<bundles_post_ra>
// kernel: tpu_custom_call.1
= control target key start
LH: loop header
LB: loop body
LE: loop exit
PB: predicated region body
PF: predicated region fallthrough
CT: control target
= control target key end

     0   :  { %10 = vsyncpa [#allocation3], 0  ;;  %s868_s0 = inlined_call_operand.hbm [shape: f32[128,128], index: 0, kind: input, shape index: {}]   ;;  %s869_s1 = inlined_call_operand.hbm [shape: f32[128,128], index: 1, kind: input, shape index: {}]   ;;  %s870_s2 = inlined_call_operand.hbm [shape: f32[128,128], index: 2, kind: output, shape index: {0}]   ;;  %s871_s3 = inlined_call_operand.hbm [shape: f32[1,128], index: 3, kind: output, shape index: {1}]   ;;  %s872_s4 = inlined_call_operand.hbm [shape: f32[1,128], index: 4, kind: output, shape index: {2}]  }
   0x1   :  { %11 = vsyncpa [#allocation6], 0 }
   0x2   :  { %12 = vsyncpa [#allocation4], 0 }
   0x3   :  { %13 = vsyncpa [#allocation9], 0  ;;  %s671_s15 = smov [#allocation2]  }
   0x4   :  { %s19_s16 = sshll.u32 %s671_s15, 4  ;;  %s20_s16 = int_to_ptr.vmem [resolvable:$true] %s19_s16 }
   0x5   :  { %s571_s17 = scalar_lea.vmem %s20_s16, 2048  ;;  %p576_p1 = scmp.lt.s32.totalorder %s20_s16, %s20_s16 }
   0x6   :  { %p572_p0 = scmp.ne.s32.totalorder %s20_s16, %s571_s17  ;;  %p577_p2 = scmp.lt.s32.totalorder %s571_s17, %s571_s17 }
   0x8   :  { %p578_p3 = por %p577_p2, %p576_p1 }
   0xa   :  { %p579_p4 = pnand %p578_p3, %p572_p0 }
   0xc   :  { %582 = shalt.err (!%p579_p4)
}
   0xd   :  { %s672_s18 = smov 128   ;;  %s673_s19 = smov 8  }
   0xe   :  { %25 = dma.hbm_to_vmem [thread:$0]  %s868_s0, 2048, %s20_s16, [#allocation3], %s672_s18, %s672_s18, %s673_s19  }
   0xf   :  { %s674_s22 = smov [#allocation5]  }
  0x10   :  { %s31_s23 = sshll.u32 %s674_s22, 4  ;;  %s32_s23 = int_to_ptr.vmem [resolvable:$true] %s31_s23 }
  0x11   :  { %s591_s24 = scalar_lea.vmem %s32_s23, 2048  ;;  %p596_p6 = scmp.lt.s32.totalorder %s32_s23, %s32_s23 }
  0x12   :  { %p592_p5 = scmp.ne.s32.totalorder %s32_s23, %s591_s24  ;;  %p597_p7 = scmp.lt.s32.totalorder %s591_s24, %s591_s24 }
  0x14   :  { %p598_p8 = por %p597_p7, %p596_p6 }
  0x16   :  { %p599_p9 = pnand %p598_p8, %p592_p5 }
  0x18   :  { %602 = shalt.err (!%p599_p9)
}
  0x19   :  { %37 = dma.hbm_to_vmem [thread:$0]  %s869_s1, 2048, %s32_s23, [#allocation6], %s672_s18, %s672_s18, %s673_s19  }
  0x1a   :  { %663 = dma.done.wait [#allocation3], 2048  }
  0x1b   :  { %664 = vsyncadd [#allocation3], 4294965248 }
  0x1c   :  { %665 = dma.done.wait [#allocation6], 2048  }
  0x1d   :  { %666 = vsyncadd [#allocation6], 4294965248  ;;  %v60_v0 = vld [vmem:[#allocation5] sm:$0xff]  ;;  %v61_v1 = vld [vmem:[#allocation5 + $0x8] sm:$0xff]  ;;  %s675_s0 = smov [#allocation8]  }
  0x1e   :  { %76 = vxpose.xlu0.b32.start [1/16] %v60_v0, 128  ;;  %v715_v2 = vld [vmem:[#allocation2 + $0x78] sm:$0xff]  ;;  %v717_v3 = vld [vmem:[#allocation2 + $0x70] sm:$0xff]  ;;  %v722_v5 = vld [vmem:[#allocation2 + $0x68] sm:$0xff]  ;;  %s409_s1 = sshll.u32 %s675_s0, 4  ;;  %s410_s1 = int_to_ptr.vmem [resolvable:$true] %s409_s1 }
  0x1f   :  { %v62_v4 = vld [vmem:[#allocation5 + $0x10] sm:$0xff]  ;;  %468 = vmatprep.subr.mxu0 %v715_v2  ;;  %524 = vmatprep.subr.mxu1 %v715_v2  ;;  %v728_v6 = vld [vmem:[#allocation2 + $0x60] sm:$0xff]  ;;  %v63_v8 = vld [vmem:[#allocation5 + $0x18] sm:$0xff]  ;;  %s603_s27 = scalar_lea.vmem %s410_s1, 16  ;;  %s607_s28 = scalar_lea.vmem %s410_s1, 32 }
  0x20   :  { %469 = vmatpush3.msra.mxu0 %v715_v2  ;;  %540 = vmatpush3.msra.mxu1 %v715_v2  ;;  %v730_v7 = vld [vmem:[#allocation2 + $0x10] sm:$0xff]  ;;  %v735_v10 = vld [vmem:[#allocation2 + $0x8] sm:$0xff]  ;;  %v737_v11 = vld [vmem:[#allocation2] sm:$0xff]  ;;  %p604_p10 = scmp.ne.s32.totalorder %s410_s1, %s603_s27  ;;  %p608_p11 = scmp.lt.s32.totalorder %s410_s1, %s410_s1 }
  0x21   :  { %470 = vmatprep.subr.mxu0 %v717_v3  ;;  %525 = vmatprep.subr.mxu1 %v717_v3  ;;  %v276_v9 = vmul.f32 %v730_v7, %v730_v7  ;;  %v741_v12 = vld [vmem:[#allocation2 + $0x58] sm:$0xff]  ;;  %v275_v13 = vmul.f32 %v735_v10, %v735_v10  ;;  %v253_v14 = vadd.f32 %v735_v10, %v737_v11  ;;  %v755_v17 = vld [vmem:[#allocation2 + $0x50] sm:$0xff]  ;;  %v64_v21 = vld [vmem:[#allocation5 + $0x20] sm:$0xff]  ;;  %p609_p12 = scmp.lt.s32.totalorder %s607_s28, %s603_s27 }
  0x22   :  { %77 = vxpose.xlu0.b32.cont [2/16] %v61_v1, 128  ;;  %471 = vmatpush3.msra.mxu0 %v717_v3  ;;  %v274_v15 = vmul.f32 %v737_v11, %v737_v11  ;;  %v751_v16 = vld [vmem:[#allocation2 + $0x18] sm:$0xff]  ;;  %v761_v22 = vld [vmem:[#allocation2 + $0x20] sm:$0xff]  ;;  %v765_v23 = vld [vmem:[#allocation2 + $0x48] sm:$0xff] }
  0x23   :  { %472 = vmatprep.subr.mxu0 %v722_v5  ;;  %541 = vmatpush3.msra.mxu1 %v717_v3  ;;  %v277_v18 = vmul.f32 %v751_v16, %v751_v16  ;;  %v254_v19 = vadd.f32 %v253_v14, %v730_v7  ;;  %v278_v24 = vmul.f32 %v761_v22, %v761_v22  ;;  %v49_v27 = vld [vmem:[#allocation2 + $0x28] sm:$0xff]  ;;  %v774_v28 = vld [vmem:[#allocation2 + $0x40] sm:$0xff]  ;;  %v780_v33 = vld [vmem:[#allocation2 + $0x38] sm:$0xff]  ;;  %p610_p13 = por %p609_p12, %p608_p11 }
  0x24   :  { %473 = vmatpush3.msra.mxu0 %v722_v5  ;;  %526 = vmatprep.subr.mxu1 %v722_v5  ;;  %v290_v20 = vadd.f32 %v275_v13, %v274_v15  ;;  %v279_v29 = vmul.f32 %v49_v27, %v49_v27  ;;  %v65_v32 = vld [vmem:[#allocation5 + $0x28] sm:$0xff]  ;;  %v784_v36 = vld [vmem:[#allocation2 + $0x30] sm:$0xff]  ;;  %v67_v40 = vld [vmem:[#allocation5 + $0x38] sm:$0xff]  ;;  %v284_v14 = vmul.f32 %v755_v17, %v755_v17 }
  0x25   :  { %474 = vmatprep.subr.mxu0 %v728_v6  ;;  %542 = vmatpush3.msra.mxu1 %v722_v5  ;;  %v255_v25 = vadd.f32 %v254_v19, %v751_v16  ;;  %v66_v39 = vld [vmem:[#allocation5 + $0x30] sm:$0xff]  ;;  %v68_v41 = vld [vmem:[#allocation5 + $0x40] sm:$0xff]  ;;  %v69_v42 = vld [vmem:[#allocation5 + $0x48] sm:$0xff]  ;;  %v280_v1 = vmul.f32 %v784_v36, %v784_v36  ;;  %p611_p0 = pnand %p610_p13, %p604_p10 }
  0x26   :  { %78 = vxpose.xlu0.b32.cont [3/16] %v62_v4, 128  ;;  %475 = vmatpush3.msra.mxu0 %v728_v6  ;;  %v291_v26 = vadd.f32 %v290_v20, %v276_v9  ;;  %v70_v43 = vld [vmem:[#allocation5 + $0x50] sm:$0xff]  ;;  %v71_v44 = vld [vmem:[#allocation5 + $0x58] sm:$0xff]  ;;  %v72_v45 = vld [vmem:[#allocation5 + $0x60] sm:$0xff]  ;;  %v281_v4 = vmul.f32 %v780_v33, %v780_v33 }
  0x27   :  { %476 = vmatprep.subr.mxu0 %v741_v12  ;;  %527 = vmatprep.subr.mxu1 %v728_v6  ;;  %v256_v30 = vadd.f32 %v255_v25, %v761_v22  ;;  %v73_v46 = vld [vmem:[#allocation5 + $0x68] sm:$0xff]  ;;  %v74_v47 = vld [vmem:[#allocation5 + $0x70] sm:$0xff]  ;;  %v75_v48 = vld [vmem:[#allocation5 + $0x78] sm:$0xff] }
  0x28   :  { %477 = vmatpush3.msra.mxu0 %v741_v12  ;;  %543 = vmatpush3.msra.mxu1 %v728_v6  ;;  %v292_v31 = vadd.f32 %v291_v26, %v277_v18  ;;  %v285_v18 = vmul.f32 %v741_v12, %v741_v12 }
  0x29   :  { %478 = vmatprep.subr.mxu0 %v755_v17  ;;  %528 = vmatprep.subr.mxu1 %v741_v12  ;;  %v257_v34 = vadd.f32 %v256_v30, %v49_v27 }
  0x2a   :  { %79 = vxpose.xlu0.b32.cont [4/16] %v63_v8, 128  ;;  %479 = vmatpush3.msra.mxu0 %v755_v17  ;;  %v293_v35 = vadd.f32 %v292_v31, %v278_v24  ;;  %v289_v31 = vmul.f32 %v715_v2, %v715_v2 }
  0x2b   :  { %480 = vmatprep.subr.mxu0 %v765_v23  ;;  %544 = vmatpush3.msra.mxu1 %v741_v12  ;;  %v789_v37 = vadd.f32 %v257_v34, %v784_v36 }
  0x2c   :  { %481 = vmatpush3.msra.mxu0 %v765_v23  ;;  %529 = vmatprep.subr.mxu1 %v755_v17  ;;  %v791_v38 = vadd.f32 %v293_v35, %v279_v29  ;;  %v288_v29 = vmul.f32 %v717_v3, %v717_v3 }
  0x2d   :  { %482 = vmatprep.subr.mxu0 %v774_v28  ;;  %545 = vmatpush3.msra.mxu1 %v755_v17  ;;  %v259_v9 = vadd.f32 %v789_v37, %v780_v33 }
  0x2e   :  { %80 = vxpose.xlu0.b32.cont [5/16] %v64_v21, 128  ;;  %483 = vmatpush3.msra.mxu0 %v774_v28  ;;  %v295_v8 = vadd.f32 %v791_v38, %v280_v1  ;;  %v286_v21 = vmul.f32 %v728_v6, %v728_v6 }
  0x2f   :  { %484 = vmatprep.subr.mxu0 %v780_v33  ;;  %530 = vmatprep.subr.mxu1 %v765_v23  ;;  %v260_v13 = vadd.f32 %v259_v9, %v774_v28 }
  0x30   :  { %485 = vmatpush3.msra.mxu0 %v780_v33  ;;  %546 = vmatpush3.msra.mxu1 %v765_v23 }
  0x31   :  { %486 = vmatprep.subr.mxu0 %v784_v36  ;;  %531 = vmatprep.subr.mxu1 %v774_v28 }
  0x32   :  { %81 = vxpose.xlu0.b32.cont [6/16] %v65_v32, 128  ;;  %487 = vmatpush3.msra.mxu0 %v784_v36 }
  0x33   :  { %488 = vmatprep.subr.mxu0 %v49_v27  ;;  %547 = vmatpush3.msra.mxu1 %v774_v28 }
  0x34   :  { %489 = vmatpush3.msra.mxu0 %v49_v27  ;;  %532 = vmatprep.subr.mxu1 %v780_v33 }
  0x35   :  { %490 = vmatprep.subr.mxu0 %v761_v22  ;;  %548 = vmatpush3.msra.mxu1 %v780_v33 }
  0x36   :  { %82 = vxpose.xlu0.b32.cont [7/16] %v66_v39, 128  ;;  %491 = vmatpush3.msra.mxu0 %v761_v22 }
  0x37   :  { %492 = vmatprep.subr.mxu0 %v751_v16  ;;  %533 = vmatprep.subr.mxu1 %v784_v36 }
  0x38   :  { %493 = vmatpush3.msra.mxu0 %v751_v16  ;;  %549 = vmatpush3.msra.mxu1 %v784_v36 }
  0x39   :  { %494 = vmatprep.subr.mxu0 %v730_v7  ;;  %534 = vmatprep.subr.mxu1 %v49_v27 }
  0x3a   :  { %83 = vxpose.xlu0.b32.cont [8/16] %v67_v40, 128  ;;  %495 = vmatpush3.msra.mxu0 %v730_v7 }
  0x3b   :  { %496 = vmatprep.subr.mxu0 %v735_v10  ;;  %550 = vmatpush3.msra.mxu1 %v49_v27  ;;  %v287_v27 = vmul.f32 %v722_v5, %v722_v5 }
  0x3c   :  { %497 = vmatpush3.msra.mxu0 %v735_v10  ;;  %535 = vmatprep.subr.mxu1 %v761_v22 }
  0x3d   :  { %498 = vmatprep.subr.mxu0 %v737_v11  ;;  %551 = vmatpush3.msra.mxu1 %v761_v22 }
  0x3e   :  { %84 = vxpose.xlu0.b32.cont [9/16] %v68_v41, 128  ;;  %499 = vmatpush3.msra.mxu0 %v737_v11 }
  0x3f   :  { %536 = vmatprep.subr.mxu1 %v751_v16 }
  0x40   :  { %552 = vmatpush3.msra.mxu1 %v751_v16  ;;  %v261_v16 = vadd.f32 %v260_v13, %v765_v23 }
  0x41   :  { %537 = vmatprep.subr.mxu1 %v730_v7 }
  0x42   :  { %85 = vxpose.xlu0.b32.cont [10/16] %v69_v42, 128  ;;  %553 = vmatpush3.msra.mxu1 %v730_v7  ;;  %v282_v7 = vmul.f32 %v774_v28, %v774_v28  ;;  %v262_v20 = vadd.f32 %v261_v16, %v755_v17 }
  0x43   :  { %538 = vmatprep.subr.mxu1 %v735_v10 }
  0x44   :  { %554 = vmatpush3.msra.mxu1 %v735_v10  ;;  %v283_v10 = vmul.f32 %v765_v23, %v765_v23  ;;  %v263_v24 = vadd.f32 %v262_v20, %v741_v12 }
  0x45   :  { %539 = vmatprep.subr.mxu1 %v737_v11 }
  0x46   :  { %86 = vxpose.xlu0.b32.cont [11/16] %v70_v43, 128  ;;  %555 = vmatpush3.msra.mxu1 %v737_v11  ;;  %v296_v11 = vadd.f32 %v295_v8, %v281_v4  ;;  %v264_v26 = vadd.f32 %v263_v24, %v728_v6 }
  0x48   :  { %v297_v15 = vadd.f32 %v296_v11, %v282_v7  ;;  %v265_v23 = vadd.f32 %v264_v26, %v722_v5 }
  0x4a   :  { %87 = vxpose.xlu0.b32.cont [12/16] %v71_v44, 128  ;;  %v298_v19 = vadd.f32 %v297_v15, %v283_v10  ;;  %v266_v17 = vadd.f32 %v265_v23, %v717_v3 }
  0x4c   :  { %v299_v22 = vadd.f32 %v298_v19, %v284_v14  ;;  %v267_v12 = vadd.f32 %v266_v17, %v715_v2 }
  0x4e   :  { %88 = vxpose.xlu0.b32.cont [13/16] %v72_v45, 128  ;;  %v300_v25 = vadd.f32 %v299_v22, %v285_v18  ;;  %v268_v6 = vrot.slane %v267_v12, 4 }
  0x50   :  { %v301_v28 = vadd.f32 %v300_v25, %v286_v21  ;;  %v269_v35 = vadd.f32 %v268_v6, %v267_v12 }
  0x52   :  { %89 = vxpose.xlu0.b32.cont [14/16] %v73_v46, 128  ;;  %v302_v30 = vadd.f32 %v301_v28, %v287_v27  ;;  %v270_v37 = vrot.slane %v269_v35, 2 }
  0x54   :  { %v303_v32 = vadd.f32 %v302_v30, %v288_v29  ;;  %v271_v5 = vadd.f32 %v270_v37, %v269_v35 }
  0x56   :  { %90 = vxpose.xlu0.b32.cont [15/16] %v74_v47, 128  ;;  %v304_v33 = vadd.f32 %v303_v32, %v289_v31  ;;  %v272_v40 = vrot.slane %v271_v5, 1 }
  0x58   :  { %v305_v34 = vrot.slane %v304_v33, 4  ;;  %v273_v42 = vadd.f32 %v272_v40, %v271_v5 }
  0x5a   :  { %91 = vxpose.xlu0.b32.end [16/16] %v75_v48, 128  ;;  %v306_v36 = vadd.f32 %v305_v34, %v304_v33  ;;  %331 = vst [vmem:[#allocation8] sm:$0x1] %v273_v42 }
  0x5c   :  { %v307_v38 = vrot.slane %v306_v36, 2 }
  0x5e   :  { %v308_v39 = vadd.f32 %v307_v38, %v306_v36 }
  0x60   :  { %v309_v41 = vrot.slane %v308_v39, 1 }
  0x62   :  { %v310_v3 = vadd.f32 %v309_v41, %v308_v39 }
  0x9a   :  { %v92_v49 = vpop.trf.xlu0 }
  0x9b   :  { %500 = vmatprep.mubr.f32.mxu0 %v92_v49 }
  0x9e   :  { %v93_v50 = vpop.trf.xlu0 }
  0x9f   :  { %501 = vmatmul.mubr.f32.vlgmr.msra.gmra.mxu0 %v93_v50 }
  0xa2   :  { %v94_v51 = vpop.trf.xlu0 }
  0xa3   :  { %503 = vmatprep.mubr.f32.mxu0 %v94_v51 }
  0xa6   :  { %v95_v52 = vpop.trf.xlu0 }
  0xa7   :  { %504 = vmatmul.mubr.f32.gmra.mxu0 %v95_v52 }
  0xaa   :  { %v96_v53 = vpop.trf.xlu0 }
  0xab   :  { %506 = vmatprep.mubr.f32.mxu0 %v96_v53 }
  0xae   :  { %v97_v54 = vpop.trf.xlu0 }
  0xaf   :  { %507 = vmatmul.mubr.f32.gmra.mxu0 %v97_v54 }
  0xb2   :  { %v98_v55 = vpop.trf.xlu0 }
  0xb3   :  { %509 = vmatprep.mubr.f32.mxu0 %v98_v55 }
  0xb6   :  { %v99_v56 = vpop.trf.xlu0 }
  0xb7   :  { %510 = vmatmul.mubr.f32.gmra.mxu0 %v99_v56 }
  0xba   :  { %v100_v57 = vpop.trf.xlu0 }
  0xbb   :  { %512 = vmatprep.mubr.f32.mxu1 %v100_v57 }
  0xbe   :  { %v101_v58 = vpop.trf.xlu0 }
  0xbf   :  { %513 = vmatmul.mubr.f32.vlgmr.msra.gmra.mxu1 %v101_v58 }
  0xc2   :  { %v102_v59 = vpop.trf.xlu0 }
  0xc3   :  { %515 = vmatprep.mubr.f32.mxu1 %v102_v59 }
  0xc6   :  { %v103_v60 = vpop.trf.xlu0 }
  0xc7   :  { %516 = vmatmul.mubr.f32.gmra.mxu1 %v103_v60 }
  0xca   :  { %v104_v61 = vpop.trf.xlu0 }
  0xcb   :  { %518 = vmatprep.mubr.f32.mxu1 %v104_v61 }
  0xce   :  { %v105_v62 = vpop.trf.xlu0 }
  0xcf   :  { %519 = vmatmul.mubr.f32.gmra.mxu1 %v105_v62 }
  0xd2   :  { %v106_v63 = vpop.trf.xlu0 }
  0xd3   :  { %521 = vmatprep.mubr.f32.mxu1 %v106_v63 }
  0xd6   :  { %v107_v0 = vpop.trf.xlu0 }
  0xd7   :  { %522 = vmatmul.mubr.f32.gmra.mxu1 %v107_v0 }
  0xd8   :  { %614 = shalt.err (!%p611_p0)
}
  0xd9   :  { %412 = dma.vmem_to_hbm [thread:$0]  %s410_s1, 16, %s871_s3, [#allocation9]   ;;  %332 = vst [vmem:[#allocation10] sm:$0x1] %v310_v3 }
  0xda   :  { %s676_s5 = smov [#allocation10]  }
  0xdb   :  { %s419_s6 = sshll.u32 %s676_s5, 4  ;;  %s420_s6 = int_to_ptr.vmem [resolvable:$true] %s419_s6 }
  0xdc   :  { %s623_s7 = scalar_lea.vmem %s420_s6, 16  ;;  %s627_s8 = scalar_lea.vmem %s420_s6, 32 }
  0xdd   :  { %p624_p1 = scmp.ne.s32.totalorder %s420_s6, %s623_s7  ;;  %p628_p2 = scmp.lt.s32.totalorder %s420_s6, %s420_s6 }
  0xde   :  { %p629_p3 = scmp.lt.s32.totalorder %s627_s8, %s623_s7 }
  0xe0   :  { %p630_p4 = por %p629_p3, %p628_p2 }
  0xe2   :  { %p631_p5 = pnand %p630_p4, %p624_p1 }
  0xe4   :  { %634 = shalt.err (!%p631_p5)
}
  0xe5   :  { %422 = dma.vmem_to_hbm [thread:$0]  %s420_s6, 16, %s872_s4, [#allocation9]  }
  0xe6   :  { %s677_s3 = smov [#allocation7]  }
  0xe7   :  { %s396_s4 = sshll.u32 %s677_s3, 4  ;;  %s397_s4 = int_to_ptr.vmem [resolvable:$true] %s396_s4 }
  0xe8   :  { %s643_s11 = scalar_lea.vmem %s397_s4, 2048  ;;  %p648_p7 = scmp.lt.s32.totalorder %s397_s4, %s397_s4 }
  0xe9   :  { %p644_p6 = scmp.ne.s32.totalorder %s397_s4, %s643_s11  ;;  %p649_p8 = scmp.lt.s32.totalorder %s643_s11, %s643_s11 }
  0xeb   :  { %p650_p9 = por %p649_p8, %p648_p7 }
  0xed   :  { %p651_p10 = pnand %p650_p9, %p644_p6 }
 0x15f   :  { %v502_v2 = vpop.f32.mrf.mxu0 }
 0x160   :  { %316 = vst [vmem:[#allocation7 + $0x8] sm:$0xff] %v502_v2 }
 0x161   :  { %v174_v43 = vpop.f32.mrf.mxu0 }
 0x162   :  { %315 = vst [vmem:[#allocation7] sm:$0xff] %v174_v43 }
 0x167   :  { %v505_v44 = vpop.f32.mrf.mxu0 }
 0x168   :  { %318 = vst [vmem:[#allocation7 + $0x18] sm:$0xff] %v505_v44 }
 0x169   :  { %v184_v45 = vpop.f32.mrf.mxu0 }
 0x16a   :  { %317 = vst [vmem:[#allocation7 + $0x10] sm:$0xff] %v184_v45 }
 0x16f   :  { %v508_v46 = vpop.f32.mrf.mxu0 }
 0x170   :  { %320 = vst [vmem:[#allocation7 + $0x28] sm:$0xff] %v508_v46 }
 0x171   :  { %v194_v47 = vpop.f32.mrf.mxu0 }
 0x172   :  { %319 = vst [vmem:[#allocation7 + $0x20] sm:$0xff] %v194_v47 }
 0x177   :  { %v511_v48 = vpop.f32.mrf.mxu0 }
 0x178   :  { %322 = vst [vmem:[#allocation7 + $0x38] sm:$0xff] %v511_v48 }
 0x179   :  { %v204_v49 = vpop.f32.mrf.mxu0 }
 0x17a   :  { %321 = vst [vmem:[#allocation7 + $0x30] sm:$0xff] %v204_v49 }
 0x17f   :  { %v514_v50 = vpop.f32.mrf.mxu1 }
 0x180   :  { %324 = vst [vmem:[#allocation7 + $0x48] sm:$0xff] %v514_v50 }
 0x181   :  { %v214_v51 = vpop.f32.mrf.mxu1 }
 0x182   :  { %323 = vst [vmem:[#allocation7 + $0x40] sm:$0xff] %v214_v51 }
 0x187   :  { %v517_v52 = vpop.f32.mrf.mxu1 }
 0x188   :  { %326 = vst [vmem:[#allocation7 + $0x58] sm:$0xff] %v517_v52 }
 0x189   :  { %v224_v53 = vpop.f32.mrf.mxu1 }
 0x18a   :  { %325 = vst [vmem:[#allocation7 + $0x50] sm:$0xff] %v224_v53 }
 0x18f   :  { %v520_v54 = vpop.f32.mrf.mxu1 }
 0x190   :  { %328 = vst [vmem:[#allocation7 + $0x68] sm:$0xff] %v520_v54 }
 0x191   :  { %v234_v55 = vpop.f32.mrf.mxu1 }
 0x192   :  { %327 = vst [vmem:[#allocation7 + $0x60] sm:$0xff] %v234_v55 }
 0x197   :  { %v523_v56 = vpop.f32.mrf.mxu1 }
 0x198   :  { %330 = vst [vmem:[#allocation7 + $0x78] sm:$0xff] %v523_v56 }
 0x199   :  { %v244_v57 = vpop.f32.mrf.mxu1 }
 0x19a   :  { %329 = vst [vmem:[#allocation7 + $0x70] sm:$0xff] %v244_v57 }
 0x19b   :  { %654 = shalt.err (!%p651_p10)
}
 0x19c   :  { %402 = dma.vmem_to_hbm [thread:$0]  %s397_s4, 2048, %s870_s2, [#allocation4], %s672_s18, %s672_s18, %s673_s19  }
 0x19d   :  { %667 = dma.done.wait [#allocation4], 2048  }
 0x19e   :  { %668 = vsyncadd [#allocation4], 4294965248 }
 0x19f   :  { %669 = dma.done.wait [#allocation9], 32  }
 0x1a0   :  { %670 = vsyncadd [#allocation9], 4294967264 }
 0x1a1   :  { %432 = vsyncpa [#allocation3], 1 }
 0x1a2   :  { %433 = vsyncpa [#allocation6], 1 }
 0x1a3   :  { %434 = vsyncpa [#allocation4], 1 }
 0x1a4   :  { %435 = vsyncpa [#allocation9], 1 }

</bundles_post_ra>
